<compile_context>
chip_gen: v7x
topology: tpu7x:2x2x1
jax: 0.10.0
libtpu: 0.0.40
codegen_flags: <defaults>
</compile_context>

<pallas_src>
import functools
import math

import jax
import jax.numpy as jnp
from jax.experimental import pallas as pl
from jax.experimental.pallas import tpu as pltpu


_VMEM_LIMIT_BYTES = 48 * 1024 * 1024   # raised scoped-VMEM limit (safe v5e..v7x)
_VMEM_BUDGET_BYTES = 36 * 1024 * 1024  # budget for our double-buffered resident set


def _build_pe_table(max_seq_len: int, embed_dim: int) -> jnp.ndarray:
    """Deterministic sinusoidal table, identical to the PyTorch __init__ loop."""
    assert embed_dim % 2 == 0, "embed_dim must be even (same assumption as the PyTorch loop)"
    pos = jnp.arange(max_seq_len, dtype=jnp.float32)[:, None]          # (S_max, 1)
    i = jnp.arange(0, embed_dim, 2, dtype=jnp.float32)[None, :]        # (1, D/2)
    inv_freq = jnp.power(10000.0, i / float(embed_dim))                # 10000 ** (i/D)
    angles = pos / inv_freq                                            # (S_max, D/2)
    pe = jnp.zeros((max_seq_len, embed_dim), dtype=jnp.float32)
    pe = pe.at[:, 0::2].set(jnp.sin(angles))
    pe = pe.at[:, 1::2].set(jnp.cos(angles))
    return pe                                                          # (S_max, D)


def _target_block_bytes() -> int:
    """Generation-aware x-block target: bigger blocks where HBM is faster."""
    try:
        kind = jax.devices()[0].device_kind.lower()
    except Exception:
        kind = ""
    if any(tag in kind for tag in ("v2", "v3", "v4", "v5")):
        return 4 * 1024 * 1024          # v5e & older: modest blocks are already >95% roofline
    return 6 * 1024 * 1024              # v6e / v7x (and unknown): amortize per-step overhead


def _choose_layout(batch: int, seq_len: int, d_pad: int, itemsize: int):
    """Pick (lw, rows, tr, tb): lane-dense flattening + VMEM-safe block sizes."""
    flat = seq_len * d_pad
    if flat % 128 == 0:
        # Largest multiple of 128 (capped at 1024) that divides S*D.
        lw = min(flat, 1024)
        lw -= lw % 128
        while flat % lw != 0:
            lw -= 128
    else:
        # Only reachable when d_pad >= 128 but not 128-aligned; last dim is
        # still >= 128 wide so only a small masked tail remains.
        lw = d_pad
    rows = flat // lw

    target = _target_block_bytes()
    bpe = max(itemsize, 4)                       # pe tile is always f32 (review fix)
    per_batch_x_bytes = rows * lw * itemsize

    if per_batch_x_bytes >= target:
        tb = 1
        tr = max(8, (target // (lw * bpe)) // 8 * 8)
        tr = min(tr, rows)
    else:
        # Per-batch slab is small: keep the full (rows, lw) plane and batch-tile.
        tr = rows
        tb = max(1, target // max(per_batch_x_bytes, 1))
        tb = min(tb, batch)

    def resident(tb_, tr_):
        # double-buffered x + out blocks, plus the shared f32 pe block
        return 2 * (2 * tb_ * tr_ * lw * itemsize + tr_ * lw * 4)

    while resident(tb, tr) > _VMEM_BUDGET_BYTES:
        if tb > 1:
            tb = max(1, tb // 2)
        elif tr > 8:
            tr = max(8, (tr // 2) // 8 * 8)
        else:
            break
    return lw, rows, tr, tb


def _pos_embed_kernel(x_ref, pe_ref, o_ref, *, scale: float):
    # x_ref / o_ref: (TB, TR, LW) tiles; pe_ref: (TR, LW) f32, broadcast over TB.
    x = x_ref[...].astype(jnp.float32)
    o_ref[...] = (x * scale + pe_ref[...][None, :, :]).astype(o_ref.dtype)


def positional_embedding(x: jnp.ndarray, pe_full: jnp.ndarray, embed_dim: int) -> jnp.ndarray:
    """x: (B, S, D); pe_full: (max_seq_len, D) float32. Returns (B, S, D)."""
    B, S, D = x.shape
    assert D == embed_dim
    assert S <= pe_full.shape[0]
    itemsize = jnp.dtype(x.dtype).itemsize

    pe_s = pe_full[:S].astype(jnp.float32)

    # Lane-dense layout: pad narrow last dims to 128 so stores are full-lane vst.
    d_pad = D
    if (S * D) % 128 != 0 and D < 128:
        d_pad = 128
        x = jnp.pad(x, ((0, 0), (0, 0), (0, d_pad - D)))
        pe_s = jnp.pad(pe_s, ((0, 0), (0, d_pad - D)))

    lw, rows, tr, tb = _choose_layout(B, S, d_pad, itemsize)

    # Contiguous views to the flattened lane-dense layout.
    # NOTE: for repeated calls at a fixed (S, D, dtype), hoist/cache pe_flat
    # outside the hot path to avoid a per-call XLA copy over pe.
    x_flat = x.reshape(B, rows, lw)
    pe_flat = pe_s.reshape(rows, lw)

    scale = math.sqrt(float(embed_dim))
    kernel = functools.partial(_pos_embed_kernel, scale=scale)

    grid = (pl.cdiv(rows, tr), pl.cdiv(B, tb))

    cost = pl.CostEstimate(
        flops=2 * B * S * D,
        transcendentals=0,
        bytes_accessed=2 * B * S * D * itemsize + S * D * 4,
    )

    out_flat = pl.pallas_call(
        kernel,
        out_shape=jax.ShapeDtypeStruct((B, rows, lw), x.dtype),
        grid_spec=pltpu.PrefetchScalarGridSpec(
            num_scalar_prefetch=0,
            grid=grid,
            in_specs=[
                # x: per-(row-tile, batch-tile) slab.
                pl.BlockSpec((tb, tr, lw), lambda r, b: (b, r, 0)),
                # pe: indexed only by the row axis -> stays resident across the
                # inner batch loop (no re-DMA per batch tile).
                pl.BlockSpec((tr, lw), lambda r, b: (r, 0)),
            ],
            out_specs=pl.BlockSpec((tb, tr, lw), lambda r, b: (b, r, 0)),
        ),
        compiler_params=pltpu.CompilerParams(
            # Row axis parallel (v7x megacore sharding), batch axis arbitrary so
            # the pe-residency trick is never broken by core-sharding.
            dimension_semantics=("parallel", "arbitrary"),
            vmem_limit_bytes=_VMEM_LIMIT_BYTES,
        ),
        cost_estimate=cost,
    )(x_flat, pe_flat)

    out = out_flat.reshape(B, S, d_pad)
    if d_pad != D:
        out = out[..., :D]
    return out


def _check(batch, seq_len, embed_dim, max_seq_len, key, dtype=jnp.float32) -> None:
    x = jax.random.normal(key, (batch, seq_len, embed_dim), dtype=jnp.float32).astype(dtype)
    pe_full = _build_pe_table(max_seq_len, embed_dim)
    out = jax.block_until_ready(positional_embedding(x, pe_full, embed_dim))
    ref = (x.astype(jnp.float32) * math.sqrt(embed_dim) + pe_full[None, :seq_len, :]).astype(dtype)
    assert out.shape == (batch, seq_len, embed_dim)
    tol = 1e-5 if dtype == jnp.float32 else 2e-2
    assert jnp.allclose(out.astype(jnp.float32), ref.astype(jnp.float32), atol=tol, rtol=tol), (
        f"mismatch for shape {(batch, seq_len, embed_dim)} dtype {jnp.dtype(dtype).name}")


if __name__ == "__main__":
    key = jax.random.PRNGKey(0)
    k1, k2, k3, k4 = jax.random.split(key, 4)
    # Small shapes consistent with the module's forward: (batch, seq, embed_dim).
    _check(batch=2, seq_len=8, embed_dim=32, max_seq_len=16, key=k1)
    # Lane-dense flattened path (S*D a multiple of 128) with batch tiling.
    _check(batch=2, seq_len=64, embed_dim=128, max_seq_len=64, key=k2)
    # Narrow-D pad-to-128 path (S*D not 128-aligned) + batch tiling.
    _check(batch=3, seq_len=5, embed_dim=20, max_seq_len=8, key=k3)
    # bf16 input: f32 in-kernel compute, max(itemsize, 4) block sizing.
    _check(batch=4, seq_len=16, embed_dim=64, max_seq_len=32, key=k4, dtype=jnp.bfloat16)
    print("KERNEL_OK")
</pallas_src>

<mosaic_0001>
module attributes {stable_mosaic.version = 11 : i64} {
  func.func @_pos_embed_kernel(%arg0: i32, %arg1: i32, %arg2: memref<2x1x256xf32, #tpu.memory_space<vmem>>, %arg3: memref<1x256xf32, #tpu.memory_space<vmem>>, %arg4: memref<2x1x256xf32, #tpu.memory_space<vmem>>) attributes {dimension_semantics = [#tpu.dimension_semantics<parallel>, #tpu.dimension_semantics<arbitrary>], iteration_bounds = array<i64: 1, 1>, scalar_prefetch = 0 : i64, scratch_operands = 0 : i64, tpu.core_type = #tpu.core_type<tc>, window_params = [{transform_indices = @transform_0, window_bounds = array<i64: 2, 1, 256>}, {transform_indices = @transform_1, window_bounds = array<i64: 1, 256>}, {transform_indices = @transform_2, window_bounds = array<i64: 2, 1, 256>}]} {
    %c0 = arith.constant 0 : index
    %c0_0 = arith.constant 0 : index
    %c0_1 = arith.constant 0 : index
    %0 = vector.load %arg2[%c0, %c0_0, %c0_1] : memref<2x1x256xf32, #tpu.memory_space<vmem>>, vector<2x1x256xf32>
    %cst = arith.constant 5.65685415 : f32
    %1 = vector.broadcast %cst : f32 to vector<2x1x256xf32>
    %2 = arith.mulf %0, %1 : vector<2x1x256xf32>
    %c0_2 = arith.constant 0 : index
    %c0_3 = arith.constant 0 : index
    %3 = vector.load %arg3[%c0_2, %c0_3] : memref<1x256xf32, #tpu.memory_space<vmem>>, vector<1x256xf32>
    %4 = vector.shape_cast %3 : vector<1x256xf32> to vector<1x1x256xf32>
    %5 = vector.broadcast %4 : vector<1x1x256xf32> to vector<2x1x256xf32>
    %6 = arith.addf %2, %5 : vector<2x1x256xf32>
    %c0_4 = arith.constant 0 : index
    %c0_5 = arith.constant 0 : index
    %c0_6 = arith.constant 0 : index
    %7 = vector.load %arg4[%c0_4, %c0_5, %c0_6] : memref<2x1x256xf32, #tpu.memory_space<vmem>>, vector<2x1x256xf32>
    tpu.vector_store %arg4[%c0_4, %c0_5, %c0_6], %6 {strides = array<i32>} : memref<2x1x256xf32, #tpu.memory_space<vmem>>, vector<2x1x256xf32>,
    return
  }
  func.func @transform_0(%arg0: i32, %arg1: i32) -> (i32, i32, i32) {
    %c0_i32 = arith.constant 0 : i32
    %c0_i32_0 = arith.constant 0 : i32
    return %arg1, %arg0, %c0_i32 : i32, i32, i32
  }
  func.func @transform_1(%arg0: i32, %arg1: i32) -> (i32, i32) {
    %c0_i32 = arith.constant 0 : i32
    %c0_i32_0 = arith.constant 0 : i32
    return %arg0, %c0_i32 : i32, i32
  }
  func.func @transform_2(%arg0: i32, %arg1: i32) -> (i32, i32, i32) {
    %c0_i32 = arith.constant 0 : i32
    %c0_i32_0 = arith.constant 0 : i32
    return %arg1, %arg0, %c0_i32 : i32, i32, i32
  }
}

</mosaic_0001>

<bundles_post_ra>
// kernel: tpu_custom_call.1
= control target key start
LH: loop header
LB: loop body
LE: loop exit
PB: predicated region body
PF: predicated region fallthrough
CT: control target
= control target key end

     0   :  { %7 = vsyncpa [#allocation3], 0  ;;  %s160_s0 = inlined_call_operand.hbm [shape: f32[2,1,256], index: 0, kind: input, shape index: {}]   ;;  %s161_s1 = inlined_call_operand.vmem [shape: f32[1,256], index: 1, kind: input, shape index: {}]   ;;  %s162_s2 = inlined_call_operand.hbm [shape: f32[2,1,256], index: 2, kind: output, shape index: {}]  }
   0x1   :  { %8 = vsyncpa [#allocation4], 0  ;;  %s108_s9 = smov [#allocation2]   ;;  %s60_s13 = scalar_lea.hbm %s160_s0, 64 }
   0x2   :  { %s14_s10 = sshll.u32 %s108_s9, 4  ;;  %p61_p0 = scmp.ne.s32.totalorder %s160_s0, %s60_s13  ;;  %s15_s10 = int_to_ptr.vmem [resolvable:$true] %s14_s10 }
   0x3   :  { %p64_p1 = scmp.lt.u32.totalorder %s60_s13, %s160_s0 }
   0x5   :  { %p66_p2 = pnand %p64_p1, %p61_p0 }
   0x7   :  { %69 = shalt.err (!%p66_p2)
}
   0x8   :  { %s70_s18 = scalar_lea.vmem %s15_s10, 64  ;;  %p75_p4 = scmp.lt.s32.totalorder %s15_s10, %s15_s10 }
   0x9   :  { %p71_p3 = scmp.ne.s32.totalorder %s15_s10, %s70_s18  ;;  %p76_p5 = scmp.lt.s32.totalorder %s70_s18, %s70_s18 }
   0xb   :  { %p77_p6 = por %p76_p5, %p75_p4 }
   0xd   :  { %p78_p7 = pnand %p77_p6, %p71_p3 }
   0xf   :  { %81 = shalt.err (!%p78_p7)
}
  0x10   :  { %s109_s19 = smov 32   ;;  %s110_s20 = smov 2  }
  0x11   :  { %20 = dma.hbm_to_vmem [thread:$0]  %s160_s0, 64, %s15_s10, [#allocation3], %s109_s19, %s109_s19, %s110_s20  }
  0x12   :  { %104 = dma.done.wait [#allocation3], 64  }
  0x13   :  { %105 = vsyncadd [#allocation3], 4294967232  ;;  %v33_v0 = vlaneseq  ;;  %s111_s23 = smov [#allocation5]   ;;  %v26_v1 = vld [vmem:[#allocation2] sm:$0x3] }
  0x14   :  { %s44_s24 = sshll.u32 %s111_s23, 4  ;;  %v30_v2 = vld [vmem:[%s161_s1] sm:$0x3]  ;;  %v27_v3 = vld [vmem:[#allocation2 + $0x2] sm:$0x3]  ;;  %s45_s24 = int_to_ptr.vmem [resolvable:$true] %s44_s24 }
  0x15   :  { %v28_v4 = vmul.f32 5.656854, %v26_v1  ;;  %v29_v5 = vmul.f32 5.656854, %v27_v3  ;;  %vm35_vm0 = vcmp.lt.s32.totalorder %v33_v0, 256  ;;  %s82_s0 = scalar_lea.vmem %s45_s24, 64  ;;  %p87_p9 = scmp.lt.s32.totalorder %s45_s24, %s45_s24 }
  0x16   :  { %p83_p8 = scmp.ne.s32.totalorder %s45_s24, %s82_s0  ;;  %p88_p10 = scmp.lt.s32.totalorder %s82_s0, %s82_s0 }
  0x17   :  { %v31_v6 = vadd.f32 %v30_v2, %v28_v4  ;;  %v32_v7 = vadd.f32 %v30_v2, %v29_v5 }
  0x18   :  { %p89_p11 = por %p88_p10, %p87_p9 }
  0x19   :  { %37 = vst.msk [vmem:[#allocation5] sm:$0x3] %vm35_vm0, %v31_v6  ;;  %38 = vst.msk [vmem:[#allocation5 + $0x2] sm:$0x3] %vm35_vm0, %v32_v7 }
  0x1a   :  { %p90_p12 = pnand %p89_p11, %p83_p8 }
  0x1c   :  { %93 = shalt.err (!%p90_p12)
}
  0x1d   :  { %s94_s1 = scalar_lea.hbm %s162_s2, 64 }
  0x1e   :  { %p95_p13 = scmp.ne.s32.totalorder %s162_s2, %s94_s1  ;;  %p98_p0 = scmp.lt.u32.totalorder %s94_s1, %s162_s2 }
  0x20   :  { %p100_p1 = pnand %p98_p0, %p95_p13 }
  0x22   :  { %103 = shalt.err (!%p100_p1)
}
  0x23   :  { %50 = dma.vmem_to_hbm [thread:$0]  %s45_s24, 64, %s162_s2, [#allocation4], %s109_s19, %s109_s19, %s110_s20  }
  0x24   :  { %106 = dma.done.wait [#allocation4], 64  }
  0x25   :  { %107 = vsyncadd [#allocation4], 4294967232 }
  0x26   :  { %54 = vsyncpa [#allocation3], 1 }
  0x27   :  { %55 = vsyncpa [#allocation4], 1 }

</bundles_post_ra>
